<compile_context>
chip_gen: v5e
topology: v5e:2x2
jax: 0.10.0
libtpu: 0.0.40
codegen_flags: <defaults>
</compile_context>

<pallas_src>
import functools
import math

import jax
import jax.numpy as jnp
from jax import lax
from jax.experimental import pallas as pl
from jax.experimental.pallas import tpu as pltpu


# ---------------------------------------------------------------------------
# Kernels
# ---------------------------------------------------------------------------
def _nin_kernel_vpu(*refs, activation, has_bias):
    """Small-channel path: unrolled VPU multiply-adds, weights/bias in SMEM.

    refs: (w_ref[SMEM (C_out,C_in) f32], [b_ref SMEM (C_out,) f32],
           x_ref VMEM (C_in, t), o_ref VMEM (C_out, t))
    """
    if has_bias:
        w_ref, b_ref, x_ref, o_ref = refs
    else:
        w_ref, x_ref, o_ref = refs
        b_ref = None
    C_out, C_in = w_ref.shape

    # Load each input-channel row once (lane-dense (1, t) f32 vectors).
    xs = [x_ref[c:c + 1, :].astype(jnp.float32) for c in range(C_in)]

    for o in range(C_out):
        acc = xs[0] * w_ref[o, 0]
        for c in range(1, C_in):
            acc = acc + xs[c] * w_ref[o, c]
        if b_ref is not None:
            acc = acc + b_ref[o]
        if activation is not None:
            acc = activation(acc)
        o_ref[o:o + 1, :] = acc.astype(o_ref.dtype)


def _nin_kernel_mxu(*refs, activation, has_bias):
    """General path: MXU matmul contracting C_in (no transpose in the kernel).

    refs: (w_ref (C_out,C_in), [b_ref (C_out,1)], x_ref (C_in, t), o_ref (C_out, t))
    """
    if has_bias:
        w_ref, b_ref, x_ref, o_ref = refs
    else:
        w_ref, x_ref, o_ref = refs
        b_ref = None

    y = lax.dot_general(
        w_ref[...], x_ref[...],
        dimension_numbers=(((1,), (0,)), ((), ())),
        preferred_element_type=jnp.float32)            # (C_out, t)
    if b_ref is not None:
        y = y + b_ref[...].astype(jnp.float32)          # (C_out, 1) broadcast
    if activation is not None:
        y = activation(y)
    o_ref[...] = y.astype(o_ref.dtype)


# ---------------------------------------------------------------------------
# Wrapper
# ---------------------------------------------------------------------------
def nin_layer(x, weight, bias=None, activation=None):
    """Pallas implementation of NINLayer.forward.

    x:      (B, C_in, *spatial)   -- channels on axis 1 (NCHW-style)
    weight: (C_out, C_in)
    bias:   (C_out,) or None
    returns (B, C_out, *spatial)
    """
    B, C_in, *spatial = x.shape
    C_out = weight.shape[0]
    HW = int(math.prod(spatial)) if spatial else 1

    # Free, contiguous reshape — no layout shuffle in HBM.
    x3d = x.reshape(B, C_in, HW)

    # --- tile selection (HBM-bound op: biggest tile that fits the VMEM budget) ---
    dtype_bytes = jnp.dtype(x.dtype).itemsize
    w_bytes = C_out * C_in * jnp.dtype(weight.dtype).itemsize
    # Conservative budget so double-buffered tiles + weight fit v7x's 64 MiB VMEM.
    act_budget = max(4 * 1024 * 1024, 32 * 1024 * 1024 - w_bytes)
    per_lane = 2 * (C_in + C_out) * dtype_bytes        # double-buffered in + out tiles
    hw128 = max(128, ((HW + 127) // 128) * 128)
    t = min(2048, act_budget // per_lane, hw128)
    t = max(128, (t // 128) * 128)                     # lane-dense tile width

    # Pad HW up to a tile multiple so the pipelined path is always used.
    hw_pad = ((HW + t - 1) // t) * t
    if hw_pad != HW:
        x3d = jnp.pad(x3d, ((0, 0), (0, 0), (0, hw_pad - HW)))

    grid = (B, hw_pad // t)
    has_bias = bias is not None
    use_vpu = (C_in <= 32 and C_out <= 32 and C_in * C_out <= 128)

    x_spec = pl.BlockSpec((None, C_in, t), lambda b, j: (b, 0, j))
    o_spec = pl.BlockSpec((None, C_out, t), lambda b, j: (b, 0, j))

    operands = []
    in_specs = []
    if use_vpu:
        kernel = functools.partial(_nin_kernel_vpu,
                                   activation=activation, has_bias=has_bias)
        operands.append(weight.astype(jnp.float32))
        in_specs.append(pl.BlockSpec(memory_space=pltpu.MemorySpace.SMEM))
        if has_bias:
            operands.append(bias.astype(jnp.float32).reshape(C_out))
            in_specs.append(pl.BlockSpec(memory_space=pltpu.MemorySpace.SMEM))
    else:
        # TODO(synk): for very large C_out*C_in weights, add a C_out grid axis so
        # the resident weight block stays within v7x's 64 MiB VMEM.
        kernel = functools.partial(_nin_kernel_mxu,
                                   activation=activation, has_bias=has_bias)
        operands.append(weight)
        in_specs.append(pl.BlockSpec((C_out, C_in), lambda b, j: (0, 0)))
        if has_bias:
            operands.append(bias.reshape(C_out, 1))
            in_specs.append(pl.BlockSpec((C_out, 1), lambda b, j: (0, 0)))
    operands.append(x3d)
    in_specs.append(x_spec)

    y3d = pl.pallas_call(
        kernel,
        out_shape=jax.ShapeDtypeStruct((B, C_out, hw_pad), x.dtype),
        grid=grid,
        in_specs=in_specs,
        out_specs=o_spec,
        compiler_params=pltpu.CompilerParams(
            dimension_semantics=("parallel", "parallel"),
            vmem_limit_bytes=48 * 1024 * 1024),
    )(*operands)

    if hw_pad != HW:
        y3d = y3d[:, :, :HW]
    return y3d.reshape(B, C_out, *spatial)


def make_nin_params(key, input_features, output_features, bias=True,
                    dtype=jnp.float32):
    """xavier_uniform weight (C_out, C_in), zero bias (C_out,) — matches __init__."""
    bound = math.sqrt(6.0 / (input_features + output_features))
    w = jax.random.uniform(key, (output_features, input_features),
                           minval=-bound, maxval=bound, dtype=dtype)
    b = jnp.zeros((output_features,), dtype=dtype) if bias else None
    return w, b


def _reference(x, weight, bias=None, activation=None):
    """Pure-JAX port of the PyTorch forward."""
    out = jnp.tensordot(weight, x, axes=([1], [1]))            # (C_out, B, *spatial)
    out = jnp.moveaxis(out, 1, 0)                              # (B, C_out, *spatial)
    if bias is not None:
        out = out + bias.reshape((1, -1) + (1,) * (x.ndim - 2))
    if activation is not None:
        out = activation(out)
    return out


if __name__ == "__main__":
    key = jax.random.PRNGKey(0)
    k_x, k_w, k_x2, k_w2 = jax.random.split(key, 4)

    # --- main case: small channel counts (VPU path), bias, no activation ---
    B, C_in, H, W = 2, 4, 16, 16
    C_out = 8
    x = jax.random.normal(k_x, (B, C_in, H, W), dtype=jnp.float32)
    weight, bias = make_nin_params(k_w, C_in, C_out, bias=True)

    out = nin_layer(x, weight, bias, activation=None)
    out = jax.block_until_ready(out)
    ref = _reference(x, weight, bias, activation=None)
    assert out.shape == (B, C_out, H, W)
    assert jnp.allclose(out, ref, atol=1e-5, rtol=1e-5)

    # --- secondary case: larger channels (MXU path), no bias, tanh, odd HW (pad) ---
    B2, C_in2, H2, W2, C_out2 = 2, 48, 8, 8, 40
    x2 = jax.random.normal(k_x2, (B2, C_in2, H2, W2), dtype=jnp.float32)
    weight2, _ = make_nin_params(k_w2, C_in2, C_out2, bias=False)

    out2 = nin_layer(x2, weight2, None, activation=jnp.tanh)
    out2 = jax.block_until_ready(out2)
    ref2 = _reference(x2, weight2, None, activation=jnp.tanh)
    assert out2.shape == (B2, C_out2, H2, W2)
    assert jnp.allclose(out2, ref2, atol=1e-5, rtol=1e-5)

    print("KERNEL_OK")
</pallas_src>

<mosaic_0001>
module attributes {stable_mosaic.version = 11 : i64} {
  func.func @_nin_kernel_vpu(%arg0: i32, %arg1: i32, %arg2: memref<8x4xf32, #tpu.memory_space<smem>>, %arg3: memref<8xf32, #tpu.memory_space<smem>>, %arg4: memref<1x4x256xf32, #tpu.memory_space<vmem>>, %arg5: memref<1x8x256xf32, #tpu.memory_space<vmem>>) attributes {dimension_semantics = [#tpu.dimension_semantics<parallel>, #tpu.dimension_semantics<parallel>], iteration_bounds = array<i64: 2, 1>, scalar_prefetch = 0 : i64, scratch_operands = 0 : i64, tpu.core_type = #tpu.core_type<tc>, window_params = [{transform_indices = @transform_0, window_bounds = array<i64: 8, 4>}, {transform_indices = @transform_1, window_bounds = array<i64: 8>}, {transform_indices = @transform_2, window_bounds = array<i64: 1, 4, 256>}, {transform_indices = @transform_3, window_bounds = array<i64: 1, 8, 256>}]} {
    %c0 = arith.constant 0 : index
    %c0_0 = arith.constant 0 : index
    %c0_1 = arith.constant 0 : index
    %0 = vector.load %arg4[%c0, %c0_0, %c0_1] : memref<1x4x256xf32, #tpu.memory_space<vmem>>, vector<1x1x256xf32>
    %1 = vector.shape_cast %0 : vector<1x1x256xf32> to vector<1x256xf32>
    %c0_2 = arith.constant 0 : index
    %c1 = arith.constant 1 : index
    %c0_3 = arith.constant 0 : index
    %2 = vector.load %arg4[%c0_2, %c1, %c0_3] : memref<1x4x256xf32, #tpu.memory_space<vmem>>, vector<1x1x256xf32>
    %3 = vector.shape_cast %2 : vector<1x1x256xf32> to vector<1x256xf32>
    %c0_4 = arith.constant 0 : index
    %c2 = arith.constant 2 : index
    %c0_5 = arith.constant 0 : index
    %4 = vector.load %arg4[%c0_4, %c2, %c0_5] : memref<1x4x256xf32, #tpu.memory_space<vmem>>, vector<1x1x256xf32>
    %5 = vector.shape_cast %4 : vector<1x1x256xf32> to vector<1x256xf32>
    %c0_6 = arith.constant 0 : index
    %c3 = arith.constant 3 : index
    %c0_7 = arith.constant 0 : index
    %6 = vector.load %arg4[%c0_6, %c3, %c0_7] : memref<1x4x256xf32, #tpu.memory_space<vmem>>, vector<1x1x256xf32>
    %7 = vector.shape_cast %6 : vector<1x1x256xf32> to vector<1x256xf32>
    %c0_8 = arith.constant 0 : index
    %c0_9 = arith.constant 0 : index
    %8 = memref.load %arg2[%c0_8, %c0_9] : memref<8x4xf32, #tpu.memory_space<smem>>
    %9 = vector.broadcast %8 : f32 to vector<1x256xf32>
    %10 = arith.mulf %1, %9 : vector<1x256xf32>
    %c0_10 = arith.constant 0 : index
    %c1_11 = arith.constant 1 : index
    %11 = memref.load %arg2[%c0_10, %c1_11] : memref<8x4xf32, #tpu.memory_space<smem>>
    %12 = vector.broadcast %11 : f32 to vector<1x256xf32>
    %13 = arith.mulf %3, %12 : vector<1x256xf32>
    %14 = arith.addf %10, %13 : vector<1x256xf32>
    %c0_12 = arith.constant 0 : index
    %c2_13 = arith.constant 2 : index
    %15 = memref.load %arg2[%c0_12, %c2_13] : memref<8x4xf32, #tpu.memory_space<smem>>
    %16 = vector.broadcast %15 : f32 to vector<1x256xf32>
    %17 = arith.mulf %5, %16 : vector<1x256xf32>
    %18 = arith.addf %14, %17 : vector<1x256xf32>
    %c0_14 = arith.constant 0 : index
    %c3_15 = arith.constant 3 : index
    %19 = memref.load %arg2[%c0_14, %c3_15] : memref<8x4xf32, #tpu.memory_space<smem>>
    %20 = vector.broadcast %19 : f32 to vector<1x256xf32>
    %21 = arith.mulf %7, %20 : vector<1x256xf32>
    %22 = arith.addf %18, %21 : vector<1x256xf32>
    %c0_16 = arith.constant 0 : index
    %23 = memref.load %arg3[%c0_16] : memref<8xf32, #tpu.memory_space<smem>>
    %24 = vector.broadcast %23 : f32 to vector<1x256xf32>
    %25 = arith.addf %22, %24 : vector<1x256xf32>
    %c0_17 = arith.constant 0 : index
    %c0_18 = arith.constant 0 : index
    %c0_19 = arith.constant 0 : index
    %26 = vector.load %arg5[%c0_17, %c0_18, %c0_19] : memref<1x8x256xf32, #tpu.memory_space<vmem>>, vector<1x1x256xf32>
    %27 = vector.shape_cast %26 : vector<1x1x256xf32> to vector<1x256xf32>
    %28 = vector.shape_cast %25 : vector<1x256xf32> to vector<1x1x256xf32>
    tpu.vector_store %arg5[%c0_17, %c0_18, %c0_19], %28 {strides = array<i32>} : memref<1x8x256xf32, #tpu.memory_space<vmem>>, vector<1x1x256xf32>,
    %c1_20 = arith.constant 1 : index
    %c0_21 = arith.constant 0 : index
    %29 = memref.load %arg2[%c1_20, %c0_21] : memref<8x4xf32, #tpu.memory_space<smem>>
    %30 = vector.broadcast %29 : f32 to vector<1x256xf32>
    %31 = arith.mulf %1, %30 : vector<1x256xf32>
    %c1_22 = arith.constant 1 : index
    %c1_23 = arith.constant 1 : index
    %32 = memref.load %arg2[%c1_22, %c1_23] : memref<8x4xf32, #tpu.memory_space<smem>>
    %33 = vector.broadcast %32 : f32 to vector<1x256xf32>
    %34 = arith.mulf %3, %33 : vector<1x256xf32>
    %35 = arith.addf %31, %34 : vector<1x256xf32>
    %c1_24 = arith.constant 1 : index
    %c2_25 = arith.constant 2 : index
    %36 = memref.load %arg2[%c1_24, %c2_25] : memref<8x4xf32, #tpu.memory_space<smem>>
    %37 = vector.broadcast %36 : f32 to vector<1x256xf32>
    %38 = arith.mulf %5, %37 : vector<1x256xf32>
    %39 = arith.addf %35, %38 : vector<1x256xf32>
    %c1_26 = arith.constant 1 : index
    %c3_27 = arith.constant 3 : index
    %40 = memref.load %arg2[%c1_26, %c3_27] : memref<8x4xf32, #tpu.memory_space<smem>>
    %41 = vector.broadcast %40 : f32 to vector<1x256xf32>
    %42 = arith.mulf %7, %41 : vector<1x256xf32>
    %43 = arith.addf %39, %42 : vector<1x256xf32>
    %c1_28 = arith.constant 1 : index
    %44 = memref.load %arg3[%c1_28] : memref<8xf32, #tpu.memory_space<smem>>
    %45 = vector.broadcast %44 : f32 to vector<1x256xf32>
    %46 = arith.addf %43, %45 : vector<1x256xf32>
    %c0_29 = arith.constant 0 : index
    %c1_30 = arith.constant 1 : index
    %c0_31 = arith.constant 0 : index
    %47 = vector.load %arg5[%c0_29, %c1_30, %c0_31] : memref<1x8x256xf32, #tpu.memory_space<vmem>>, vector<1x1x256xf32>
    %48 = vector.shape_cast %47 : vector<1x1x256xf32> to vector<1x256xf32>
    %49 = vector.shape_cast %46 : vector<1x256xf32> to vector<1x1x256xf32>
    tpu.vector_store %arg5[%c0_29, %c1_30, %c0_31], %49 {strides = array<i32>} : memref<1x8x256xf32, #tpu.memory_space<vmem>>, vector<1x1x256xf32>,
    %c2_32 = arith.constant 2 : index
    %c0_33 = arith.constant 0 : index
    %50 = memref.load %arg2[%c2_32, %c0_33] : memref<8x4xf32, #tpu.memory_space<smem>>
    %51 = vector.broadcast %50 : f32 to vector<1x256xf32>
    %52 = arith.mulf %1, %51 : vector<1x256xf32>
    %c2_34 = arith.constant 2 : index
    %c1_35 = arith.constant 1 : index
    %53 = memref.load %arg2[%c2_34, %c1_35] : memref<8x4xf32, #tpu.memory_space<smem>>
    %54 = vector.broadcast %53 : f32 to vector<1x256xf32>
    %55 = arith.mulf %3, %54 : vector<1x256xf32>
    %56 = arith.addf %52, %55 : vector<1x256xf32>
    %c2_36 = arith.constant 2 : index
    %c2_37 = arith.constant 2 : index
    %57 = memref.load %arg2[%c2_36, %c2_37] : memref<8x4xf32, #tpu.memory_space<smem>>
    %58 = vector.broadcast %57 : f32 to vector<1x256xf32>
    %59 = arith.mulf %5, %58 : vector<1x256xf32>
    %60 = arith.addf %56, %59 : vector<1x256xf32>
    %c2_38 = arith.constant 2 : index
    %c3_39 = arith.constant 3 : index
    %61 = memref.load %arg2[%c2_38, %c3_39] : memref<8x4xf32, #tpu.memory_space<smem>>
    %62 = vector.broadcast %61 : f32 to vector<1x256xf32>
    %63 = arith.mulf %7, %62 : vector<1x256xf32>
    %64 = arith.addf %60, %63 : vector<1x256xf32>
    %c2_40 = arith.constant 2 : index
    %65 = memref.load %arg3[%c2_40] : memref<8xf32, #tpu.memory_space<smem>>
    %66 = vector.broadcast %65 : f32 to vector<1x256xf32>
    %67 = arith.addf %64, %66 : vector<1x256xf32>
    %c0_41 = arith.constant 0 : index
    %c2_42 = arith.constant 2 : index
    %c0_43 = arith.constant 0 : index
    %68 = vector.load %arg5[%c0_41, %c2_42, %c0_43] : memref<1x8x256xf32, #tpu.memory_space<vmem>>, vector<1x1x256xf32>
    %69 = vector.shape_cast %68 : vector<1x1x256xf32> to vector<1x256xf32>
    %70 = vector.shape_cast %67 : vector<1x256xf32> to vector<1x1x256xf32>
    tpu.vector_store %arg5[%c0_41, %c2_42, %c0_43], %70 {strides = array<i32>} : memref<1x8x256xf32, #tpu.memory_space<vmem>>, vector<1x1x256xf32>,
    %c3_44 = arith.constant 3 : index
    %c0_45 = arith.constant 0 : index
    %71 = memref.load %arg2[%c3_44, %c0_45] : memref<8x4xf32, #tpu.memory_space<smem>>
    %72 = vector.broadcast %71 : f32 to vector<1x256xf32>
    %73 = arith.mulf %1, %72 : vector<1x256xf32>
    %c3_46 = arith.constant 3 : index
    %c1_47 = arith.constant 1 : index
    %74 = memref.load %arg2[%c3_46, %c1_47] : memref<8x4xf32, #tpu.memory_space<smem>>
    %75 = vector.broadcast %74 : f32 to vector<1x256xf32>
    %76 = arith.mulf %3, %75 : vector<1x256xf32>
    %77 = arith.addf %73, %76 : vector<1x256xf32>
    %c3_48 = arith.constant 3 : index
    %c2_49 = arith.constant 2 : index
    %78 = memref.load %arg2[%c3_48, %c2_49] : memref<8x4xf32, #tpu.memory_space<smem>>
    %79 = vector.broadcast %78 : f32 to vector<1x256xf32>
    %80 = arith.mulf %5, %79 : vector<1x256xf32>
    %81 = arith.addf %77, %80 : vector<1x256xf32>
    %c3_50 = arith.constant 3 : index
    %c3_51 = arith.constant 3 : index
    %82 = memref.load %arg2[%c3_50, %c3_51] : memref<8x4xf32, #tpu.memory_space<smem>>
    %83 = vector.broadcast %82 : f32 to vector<1x256xf32>
    %84 = arith.mulf %7, %83 : vector<1x256xf32>
    %85 = arith.addf %81, %84 : vector<1x256xf32>
    %c3_52 = arith.constant 3 : index
    %86 = memref.load %arg3[%c3_52] : memref<8xf32, #tpu.memory_space<smem>>
    %87 = vector.broadcast %86 : f32 to vector<1x256xf32>
    %88 = arith.addf %85, %87 : vector<1x256xf32>
    %c0_53 = arith.constant 0 : index
    %c3_54 = arith.constant 3 : index
    %c0_55 = arith.constant 0 : index
    %89 = vector.load %arg5[%c0_53, %c3_54, %c0_55] : memref<1x8x256xf32, #tpu.memory_space<vmem>>, vector<1x1x256xf32>
    %90 = vector.shape_cast %89 : vector<1x1x256xf32> to vector<1x256xf32>
    %91 = vector.shape_cast %88 : vector<1x256xf32> to vector<1x1x256xf32>
    tpu.vector_store %arg5[%c0_53, %c3_54, %c0_55], %91 {strides = array<i32>} : memref<1x8x256xf32, #tpu.memory_space<vmem>>, vector<1x1x256xf32>,
    %c4 = arith.constant 4 : index
    %c0_56 = arith.constant 0 : index
    %92 = memref.load %arg2[%c4, %c0_56] : memref<8x4xf32, #tpu.memory_space<smem>>
    %93 = vector.broadcast %92 : f32 to vector<1x256xf32>
    %94 = arith.mulf %1, %93 : vector<1x256xf32>
    %c4_57 = arith.constant 4 : index
    %c1_58 = arith.constant 1 : index
    %95 = memref.load %arg2[%c4_57, %c1_58] : memref<8x4xf32, #tpu.memory_space<smem>>
    %96 = vector.broadcast %95 : f32 to vector<1x256xf32>
    %97 = arith.mulf %3, %96 : vector<1x256xf32>
    %98 = arith.addf %94, %97 : vector<1x256xf32>
    %c4_59 = arith.constant 4 : index
    %c2_60 = arith.constant 2 : index
    %99 = memref.load %arg2[%c4_59, %c2_60] : memref<8x4xf32, #tpu.memory_space<smem>>
    %100 = vector.broadcast %99 : f32 to vector<1x256xf32>
    %101 = arith.mulf %5, %100 : vector<1x256xf32>
    %102 = arith.addf %98, %101 : vector<1x256xf32>
    %c4_61 = arith.constant 4 : index
    %c3_62 = arith.constant 3 : index
    %103 = memref.load %arg2[%c4_61, %c3_62] : memref<8x4xf32, #tpu.memory_space<smem>>
    %104 = vector.broadcast %103 : f32 to vector<1x256xf32>
    %105 = arith.mulf %7, %104 : vector<1x256xf32>
    %106 = arith.addf %102, %105 : vector<1x256xf32>
    %c4_63 = arith.constant 4 : index
    %107 = memref.load %arg3[%c4_63] : memref<8xf32, #tpu.memory_space<smem>>
    %108 = vector.broadcast %107 : f32 to vector<1x256xf32>
    %109 = arith.addf %106, %108 : vector<1x256xf32>
    %c0_64 = arith.constant 0 : index
    %c4_65 = arith.constant 4 : index
    %c0_66 = arith.constant 0 : index
    %110 = vector.load %arg5[%c0_64, %c4_65, %c0_66] : memref<1x8x256xf32, #tpu.memory_space<vmem>>, vector<1x1x256xf32>
    %111 = vector.shape_cast %110 : vector<1x1x256xf32> to vector<1x256xf32>
    %112 = vector.shape_cast %109 : vector<1x256xf32> to vector<1x1x256xf32>
    tpu.vector_store %arg5[%c0_64, %c4_65, %c0_66], %112 {strides = array<i32>} : memref<1x8x256xf32, #tpu.memory_space<vmem>>, vector<1x1x256xf32>,
    %c5 = arith.constant 5 : index
    %c0_67 = arith.constant 0 : index
    %113 = memref.load %arg2[%c5, %c0_67] : memref<8x4xf32, #tpu.memory_space<smem>>
    %114 = vector.broadcast %113 : f32 to vector<1x256xf32>
    %115 = arith.mulf %1, %114 : vector<1x256xf32>
    %c5_68 = arith.constant 5 : index
    %c1_69 = arith.constant 1 : index
    %116 = memref.load %arg2[%c5_68, %c1_69] : memref<8x4xf32, #tpu.memory_space<smem>>
    %117 = vector.broadcast %116 : f32 to vector<1x256xf32>
    %118 = arith.mulf %3, %117 : vector<1x256xf32>
    %119 = arith.addf %115, %118 : vector<1x256xf32>
    %c5_70 = arith.constant 5 : index
    %c2_71 = arith.constant 2 : index
    %120 = memref.load %arg2[%c5_70, %c2_71] : memref<8x4xf32, #tpu.memory_space<smem>>
    %121 = vector.broadcast %120 : f32 to vector<1x256xf32>
    %122 = arith.mulf %5, %121 : vector<1x256xf32>
    %123 = arith.addf %119, %122 : vector<1x256xf32>
    %c5_72 = arith.constant 5 : index
    %c3_73 = arith.constant 3 : index
    %124 = memref.load %arg2[%c5_72, %c3_73] : memref<8x4xf32, #tpu.memory_space<smem>>
    %125 = vector.broadcast %124 : f32 to vector<1x256xf32>
    %126 = arith.mulf %7, %125 : vector<1x256xf32>
    %127 = arith.addf %123, %126 : vector<1x256xf32>
    %c5_74 = arith.constant 5 : index
    %128 = memref.load %arg3[%c5_74] : memref<8xf32, #tpu.memory_space<smem>>
    %129 = vector.broadcast %128 : f32 to vector<1x256xf32>
    %130 = arith.addf %127, %129 : vector<1x256xf32>
    %c0_75 = arith.constant 0 : index
    %c5_76 = arith.constant 5 : index
    %c0_77 = arith.constant 0 : index
    %131 = vector.load %arg5[%c0_75, %c5_76, %c0_77] : memref<1x8x256xf32, #tpu.memory_space<vmem>>, vector<1x1x256xf32>
    %132 = vector.shape_cast %131 : vector<1x1x256xf32> to vector<1x256xf32>
    %133 = vector.shape_cast %130 : vector<1x256xf32> to vector<1x1x256xf32>
    tpu.vector_store %arg5[%c0_75, %c5_76, %c0_77], %133 {strides = array<i32>} : memref<1x8x256xf32, #tpu.memory_space<vmem>>, vector<1x1x256xf32>,
    %c6 = arith.constant 6 : index
    %c0_78 = arith.constant 0 : index
    %134 = memref.load %arg2[%c6, %c0_78] : memref<8x4xf32, #tpu.memory_space<smem>>
    %135 = vector.broadcast %134 : f32 to vector<1x256xf32>
    %136 = arith.mulf %1, %135 : vector<1x256xf32>
    %c6_79 = arith.constant 6 : index
    %c1_80 = arith.constant 1 : index
    %137 = memref.load %arg2[%c6_79, %c1_80] : memref<8x4xf32, #tpu.memory_space<smem>>
    %138 = vector.broadcast %137 : f32 to vector<1x256xf32>
    %139 = arith.mulf %3, %138 : vector<1x256xf32>
    %140 = arith.addf %136, %139 : vector<1x256xf32>
    %c6_81 = arith.constant 6 : index
    %c2_82 = arith.constant 2 : index
    %141 = memref.load %arg2[%c6_81, %c2_82] : memref<8x4xf32, #tpu.memory_space<smem>>
    %142 = vector.broadcast %141 : f32 to vector<1x256xf32>
    %143 = arith.mulf %5, %142 : vector<1x256xf32>
    %144 = arith.addf %140, %143 : vector<1x256xf32>
    %c6_83 = arith.constant 6 : index
    %c3_84 = arith.constant 3 : index
    %145 = memref.load %arg2[%c6_83, %c3_84] : memref<8x4xf32, #tpu.memory_space<smem>>
    %146 = vector.broadcast %145 : f32 to vector<1x256xf32>
    %147 = arith.mulf %7, %146 : vector<1x256xf32>
    %148 = arith.addf %144, %147 : vector<1x256xf32>
    %c6_85 = arith.constant 6 : index
    %149 = memref.load %arg3[%c6_85] : memref<8xf32, #tpu.memory_space<smem>>
    %150 = vector.broadcast %149 : f32 to vector<1x256xf32>
    %151 = arith.addf %148, %150 : vector<1x256xf32>
    %c0_86 = arith.constant 0 : index
    %c6_87 = arith.constant 6 : index
    %c0_88 = arith.constant 0 : index
    %152 = vector.load %arg5[%c0_86, %c6_87, %c0_88] : memref<1x8x256xf32, #tpu.memory_space<vmem>>, vector<1x1x256xf32>
    %153 = vector.shape_cast %152 : vector<1x1x256xf32> to vector<1x256xf32>
    %154 = vector.shape_cast %151 : vector<1x256xf32> to vector<1x1x256xf32>
    tpu.vector_store %arg5[%c0_86, %c6_87, %c0_88], %154 {strides = array<i32>} : memref<1x8x256xf32, #tpu.memory_space<vmem>>, vector<1x1x256xf32>,
    %c7 = arith.constant 7 : index
    %c0_89 = arith.constant 0 : index
    %155 = memref.load %arg2[%c7, %c0_89] : memref<8x4xf32, #tpu.memory_space<smem>>
    %156 = vector.broadcast %155 : f32 to vector<1x256xf32>
    %157 = arith.mulf %1, %156 : vector<1x256xf32>
    %c7_90 = arith.constant 7 : index
    %c1_91 = arith.constant 1 : index
    %158 = memref.load %arg2[%c7_90, %c1_91] : memref<8x4xf32, #tpu.memory_space<smem>>
    %159 = vector.broadcast %158 : f32 to vector<1x256xf32>
    %160 = arith.mulf %3, %159 : vector<1x256xf32>
    %161 = arith.addf %157, %160 : vector<1x256xf32>
    %c7_92 = arith.constant 7 : index
    %c2_93 = arith.constant 2 : index
    %162 = memref.load %arg2[%c7_92, %c2_93] : memref<8x4xf32, #tpu.memory_space<smem>>
    %163 = vector.broadcast %162 : f32 to vector<1x256xf32>
    %164 = arith.mulf %5, %163 : vector<1x256xf32>
    %165 = arith.addf %161, %164 : vector<1x256xf32>
    %c7_94 = arith.constant 7 : index
    %c3_95 = arith.constant 3 : index
    %166 = memref.load %arg2[%c7_94, %c3_95] : memref<8x4xf32, #tpu.memory_space<smem>>
    %167 = vector.broadcast %166 : f32 to vector<1x256xf32>
    %168 = arith.mulf %7, %167 : vector<1x256xf32>
    %169 = arith.addf %165, %168 : vector<1x256xf32>
    %c7_96 = arith.constant 7 : index
    %170 = memref.load %arg3[%c7_96] : memref<8xf32, #tpu.memory_space<smem>>
    %171 = vector.broadcast %170 : f32 to vector<1x256xf32>
    %172 = arith.addf %169, %171 : vector<1x256xf32>
    %c0_97 = arith.constant 0 : index
    %c7_98 = arith.constant 7 : index
    %c0_99 = arith.constant 0 : index
    %173 = vector.load %arg5[%c0_97, %c7_98, %c0_99] : memref<1x8x256xf32, #tpu.memory_space<vmem>>, vector<1x1x256xf32>
    %174 = vector.shape_cast %173 : vector<1x1x256xf32> to vector<1x256xf32>
    %175 = vector.shape_cast %172 : vector<1x256xf32> to vector<1x1x256xf32>
    tpu.vector_store %arg5[%c0_97, %c7_98, %c0_99], %175 {strides = array<i32>} : memref<1x8x256xf32, #tpu.memory_space<vmem>>, vector<1x1x256xf32>,
    return
  }
  func.func @transform_0(%arg0: i32, %arg1: i32) -> (i32, i32) {
    %c0_i32 = arith.constant 0 : i32
    %c0_i32_0 = arith.constant 0 : i32
    %c0_i32_1 = arith.constant 0 : i32
    return %c0_i32, %c0_i32_0 : i32, i32
  }
  func.func @transform_1(%arg0: i32, %arg1: i32) -> i32 {
    %c0_i32 = arith.constant 0 : i32
    %c0_i32_0 = arith.constant 0 : i32
    return %c0_i32 : i32
  }
  func.func @transform_2(%arg0: i32, %arg1: i32) -> (i32, i32, i32) {
    %c0_i32 = arith.constant 0 : i32
    %c0_i32_0 = arith.constant 0 : i32
    return %arg0, %c0_i32, %arg1 : i32, i32, i32
  }
  func.func @transform_3(%arg0: i32, %arg1: i32) -> (i32, i32, i32) {
    %c0_i32 = arith.constant 0 : i32
    %c0_i32_0 = arith.constant 0 : i32
    return %arg0, %c0_i32, %arg1 : i32, i32, i32
  }
}

</mosaic_0001>

<bundles_post_ra>
// kernel: tpu_custom_call.1
= control target key start
LH: loop header
LB: loop body
LE: loop exit
PB: predicated region body
PF: predicated region fallthrough
CT: control target
= control target key end

     0   :  { %8 = vsyncpa [#allocation5], 0  ;;  %s1104_s0 = inlined_call_operand.vmem [shape: f32[8,4], index: 0, kind: input, shape index: {}]   ;;  %s1105_s1 = inlined_call_operand.vmem [shape: f32[8], index: 1, kind: input, shape index: {}]   ;;  %s1106_s2 = inlined_call_operand.hbm [shape: f32[2,4,256], index: 2, kind: input, shape index: {}]   ;;  %s1107_s3 = inlined_call_operand.hbm [shape: f32[2,8,256], index: 3, kind: output, shape index: {}]  }
   0x1   :  { %9 = vsyncpa [#allocation7], 0 }
   0x2   :  { %10 = vsyncpa [#allocation3], 0 }
   0x3   :  { %12 = vsyncpa [#allocation3 + $0x1], 0 }
   0x4   :  { %13 = vsyncpa [#allocation4], 0 }
   0x5   :  { %15 = vsyncpa [#allocation4 + $0x1], 0  ;;  %s865_s12 = smov 0   ;;  %s867_s13 = smov 0  }
   0x6   :  { %s869_s14 = smov 0   ;;  %s871_s15 = smov 0  }
   0x7   :  { %s873_s16 = smov 0   ;;  %s875_s17 = smov 0  }
   0x8 LB: > { %s539_s18 = sadd.s32 4294967295, %s841_s17   ;;  %s540_s19 = sadd.s32 4294967294, %s841_s17   ;;  %s841_s17 = sphi %s875_s17, %s21_s17   ;;  %s837_s16 = sphi %s873_s16, %s1119_s16   ;;  %s833_s15 = sphi %s871_s15, %s1118_s15   ;;  %s829_s14 = sphi %s869_s14, %s1117_s14   ;;  %s825_s13 = sphi %s867_s13, %s1116_s13   ;;  %s821_s12 = sphi %s865_s12, %s1115_s12  }
   0x9   : > { %p97_p0 = scmp.ne.s32.totalorder %s825_s13, %s821_s12  ;;  %p899_p1 = scmp.eq.s32.totalorder %s539_s18, 0 }
   0xa   : > { %p129_p2 = scmp.eq.s32.totalorder %s540_s19, 1  ;;  %p541_p4 = scmp.ge.s32.totalorder %s841_s17, 1 }
   0xb   : > { %p905_p3 = por %p899_p1, %p97_p0  ;;  %p136_p6 = scmp.lt.s32.totalorder %s841_s17, 3 }
   0xc   : > { %p910_p5 = por %p129_p2, %p97_p0  ;;  %s148_s25 = sshll.u32 %s1104_s0, 4  ;;  %s149_s25 = int_to_ptr.vmem [resolvable:$true] %s148_s25 }
   0xd   : > { %p918_p7 = pnand %p541_p4, %p136_p6  ;;  %p544_p8 = scmp.ge.s32.totalorder %s841_s17, 2 }
   0xe   : > { %s158_s29 = sshll.u32 %s1105_s1, 4  ;;  %s843_s30 = smov [#allocation2]   ;;  %s159_s29 = int_to_ptr.vmem [resolvable:$true] %s158_s29 }
   0xf   : > { %p620_p9 = pneg %p918_p7  ;;  %s844_s4 = smov [#allocation6]  }
  0x10   : > { %p123_p11 = scmp.eq.s32.totalorder %s539_s18, 1  ;;  %s33_s5 = sadd.s32 1, %s837_s16 }
  0x11   : > { %p621_p10 = pnand %p620_p9, %p899_p1  ;;  %p35_p12 = scmp.ge.s32.totalorder %s33_s5, 2 }
  0x12   : > { %s84_s6 = sadd.s32 1, %s829_s14  ;;  %p91_p13 = scmp.ne.s32.totalorder %s829_s14, %s825_s13 }
  0x13   : > { %623 = dma.vmem_to_smem (!%p621_p10), %s149_s25, 128, %s843_s30, [#allocation5]  }
  0x14   : > { %626 = dma.vmem_to_smem (!%p621_p10), %s159_s29, 16, %s844_s4, [#allocation7]  }
  0x15   : > { %p92_p0 = scmp.eq.s32.totalorder %s841_s17, 0  ;;  %s1121_s5 = smov (%p35_p12, %s33_s5), 0 }
  0x16   : > { %p937_p2 = por %p123_p11, %p91_p13  ;;  %p637_p4 = scmp.lt.s32.totalorder %s841_s17, 2 }
  0x17   : > { %s79_s8 = ssub.s32 %s837_s16, %s1121_s5  ;;  %s169_s9 = sand.u32 1, %s829_s14  }
  0x18   : > { %p82_p6 = scmp.eq.s32.totalorder %s79_s8, 0  ;;  %p93_p9 = por %p92_p0, %p91_p13 }
  0x19   : > { %s545_s10 = sshll.u32 %s169_s9, 3  ;;  %s606_s11 = sshll.u32 %s837_s16, 3 }
  0x1a   : > { %s947_s18 = scalar_select %p82_p6, %s829_s14, %s84_s6  }
  0x1b   : > { %s180_s24 = scalar_lea.hbm %s1106_s2, %s606_s11  ;;  %s173_s27 = scalar_lea.vmem [#allocation8], %s545_s10 }
  0x1c   : > { %s182_s25 = sshll.u32 %s180_s24, 4  ;;  %s184_s28 = sshll.u32 %s173_s27, 4  ;;  %s183_s25 = int_to_ptr.hbm [resolvable:$true] %s182_s25  ;;  %s185_s28 = int_to_ptr.vmem [resolvable:$true] %s184_s28 }
  0x1d   : > { %p628_p10 = pnand %p637_p4, %p93_p9  ;;  %s170_s29 = scalar_lea.sflag [#allocation3], %s169_s9 }
  0x1e   : > { %193 = sbr.rel (%p918_p7) target bundleno = 100 (0x64), region = 32 }
  0x1f   : > { %630 = dma.hbm_to_vmem [thread:$0]  (!%p628_p10), %s183_s25, 128, %s185_s28, %s170_s29  }
  0x23   : > { %804 = dma.done.wait (%p899_p1), [#allocation5], 128  }
  0x24   : > { %806 = vsyncadd (%p899_p1), [#allocation5], 4294967168 }
  0x25   : > { %808 = dma.done.wait (%p899_p1), [#allocation7], 16  }
  0x26   : > { %810 = vsyncadd (%p899_p1), [#allocation7], 4294967280  ;;  %s965_s30 = sand.u32 1, %s825_s13  }
  0x27   : > { %s551_s26 = sshll.u32 %s965_s30, 3  ;;  %s206_s4 = scalar_lea.sflag [#allocation3], %s965_s30 }
  0x28   : > { %s209_s6 = scalar_lea.vmem [#allocation8], %s551_s26 }
  0x29   : > { %812 = dma.done.wait (%p905_p3), %s206_s4, 128  }
  0x2a   : > { %814 = vsyncadd (%p905_p3), %s206_s4, 4294967168 }
  0x2b   : > { %215 = sfence }
  0x2c   : > { %s243_s8 = sld [smem:[#allocation2]]  ;;  %v973_v0 = vld [vmem:[%s209_s6] ss:$4 sm:$0x3]  ;;  %v261_v13 = vlaneseq  ;;  %s552_s28 = sshll.u32 %s965_s30, 4 }
  0x2d   : > { %s556_s9 = sld [smem:[#allocation2 + $0x1]]  ;;  %v975_v1 = vld [vmem:[%s209_s6 + $0x1] ss:$4 sm:$0x3] }
  0x2e   : > { %s557_s10 = sld [smem:[#allocation2 + $0x2]]  ;;  %v979_v3 = vld [vmem:[%s209_s6 + $0x2] ss:$4 sm:$0x3]  ;;  %vm993_vm0 = vcmp.lt.s32.totalorder %v261_v13, 256 }
  0x2f   : > { %s558_s20 = sld [smem:[#allocation2 + $0x3]]  ;;  %v982_v6 = vld [vmem:[%s209_s6 + $0x3] ss:$4 sm:$0x3] }
  0x30   : > { %s977_s11 = sld [smem:[#allocation6]] }
  0x31   : > { %s559_s19 = sld [smem:[#allocation2 + $0x80]] }
  0x32   : > { %v244_v2 = vstv %s243_s8  ;;  %s560_s21 = sld [smem:[#allocation2 + $0x81]] }
  0x33   : > { %v245_v4 = vmul.f32 %v244_v2, %v973_v0  ;;  %v247_v5 = vstv %s556_s9  ;;  %s561_s23 = sld [smem:[#allocation2 + $0x82]] }
  0x34   : > { %v248_v7 = vmul.f32 %v975_v1, %v247_v5  ;;  %v251_v8 = vstv %s557_s10  ;;  %s562_s24 = sld [smem:[#allocation2 + $0x83]]  ;;  %s1001_s10 = scalar_lea.vmem [#allocation9], %s552_s28 }
  0x35   : > { %v252_v10 = vmul.f32 %v979_v3, %v251_v8  ;;  %v255_v11 = vstv %s558_s20  ;;  %s986_s25 = sld [smem:[#allocation6 + $0x1]] }
  0x36   : > { %v249_v9 = vadd.f32 %v248_v7, %v245_v4  ;;  %v256_v12 = vmul.f32 %v982_v6, %v255_v11  ;;  %s565_s27 = sld [smem:[#allocation2 + $0x100]]  ;;  %v259_v16 = vstv %s977_s11 }
  0x37   : > { %v268_v15 = vstv %s559_s19  ;;  %s566_s29 = sld [smem:[#allocation2 + $0x101]] }
  0x38   : > { %v253_v14 = vadd.f32 %v252_v10, %v249_v9  ;;  %v269_v17 = vmul.f32 %v268_v15, %v973_v0  ;;  %v271_v18 = vstv %s560_s21  ;;  %s567_s26 = sld [smem:[#allocation2 + $0x102]] }
  0x39   : > { %v272_v20 = vmul.f32 %v975_v1, %v271_v18  ;;  %v275_v21 = vstv %s561_s23  ;;  %s568_s4 = sld [smem:[#allocation2 + $0x103]] }
  0x3a   : > { %v257_v19 = vadd.f32 %v256_v12, %v253_v14  ;;  %v276_v23 = vmul.f32 %v979_v3, %v275_v21  ;;  %v279_v24 = vstv %s562_s24  ;;  %s998_s6 = sld [smem:[#allocation6 + $0x2]] }
  0x3b   : > { %v273_v26 = vadd.f32 %v272_v20, %v269_v17  ;;  %v280_v27 = vmul.f32 %v982_v6, %v279_v24  ;;  %s571_s8 = sld [smem:[#allocation2 + $0x180]]  ;;  %v283_v32 = vstv %s986_s25 }
  0x3c   : > { %v260_v25 = vadd.f32 %v259_v16, %v257_v19  ;;  %v289_v28 = vstv %s565_s27  ;;  %s572_s9 = sld [smem:[#allocation2 + $0x181]] }
  0x3d   : > { %v277_v29 = vadd.f32 %v276_v23, %v273_v26  ;;  %v290_v30 = vmul.f32 %v289_v28, %v973_v0  ;;  %v292_v31 = vstv %s566_s29  ;;  %s573_s20 = sld [smem:[#allocation2 + $0x182]] }
  0x3e   : > { %265 = vst.msk [vmem:[%s1001_s10] ss:$8 sm:$0x3] %vm993_vm0, %v260_v25  ;;  %v293_v33 = vmul.f32 %v975_v1, %v292_v31  ;;  %v296_v34 = vstv %s567_s26  ;;  %s574_s11 = sld [smem:[#allocation2 + $0x183]] }
  0x3f   : > { %v281_v35 = vadd.f32 %v280_v27, %v277_v29  ;;  %v297_v36 = vmul.f32 %v979_v3, %v296_v34  ;;  %v300_v37 = vstv %s568_s4  ;;  %s1010_s19 = sld [smem:[#allocation6 + $0x3]] }
  0x40   : > { %v294_v38 = vadd.f32 %v293_v33, %v290_v30  ;;  %v301_v39 = vmul.f32 %v982_v6, %v300_v37  ;;  %s577_s21 = sld [smem:[#allocation2 + $0x200]]  ;;  %v304_v45 = vstv %s998_s6 }
  0x41   : > { %v284_v40 = vadd.f32 %v283_v32, %v281_v35  ;;  %v310_v41 = vstv %s571_s8  ;;  %s578_s23 = sld [smem:[#allocation2 + $0x201]] }
  0x42   : > { %v298_v42 = vadd.f32 %v297_v36, %v294_v38  ;;  %v311_v43 = vmul.f32 %v310_v41, %v973_v0  ;;  %v313_v44 = vstv %s572_s9  ;;  %s579_s24 = sld [smem:[#allocation2 + $0x202]] }
  0x43   : > { %564 = vst.msk [vmem:[%s1001_s10 + $0x1] ss:$8 sm:$0x3] %vm993_vm0, %v284_v40  ;;  %v314_v46 = vmul.f32 %v975_v1, %v313_v44  ;;  %v317_v47 = vstv %s573_s20  ;;  %s580_s25 = sld [smem:[#allocation2 + $0x203]] }
  0x44   : > { %v302_v48 = vadd.f32 %v301_v39, %v298_v42  ;;  %v318_v49 = vmul.f32 %v979_v3, %v317_v47  ;;  %v321_v50 = vstv %s574_s11  ;;  %s1020_s27 = sld [smem:[#allocation6 + $0x4]] }
  0x45   : > { %v315_v51 = vadd.f32 %v314_v46, %v311_v43  ;;  %v322_v52 = vmul.f32 %v982_v6, %v321_v50  ;;  %s583_s28 = sld [smem:[#allocation2 + $0x280]]  ;;  %v325_v58 = vstv %s1010_s19 }
  0x46   : > { %v305_v53 = vadd.f32 %v304_v45, %v302_v48  ;;  %v331_v54 = vstv %s577_s21  ;;  %s584_s29 = sld [smem:[#allocation2 + $0x281]] }
  0x47   : > { %v319_v55 = vadd.f32 %v318_v49, %v315_v51  ;;  %v332_v56 = vmul.f32 %v331_v54, %v973_v0  ;;  %v334_v57 = vstv %s578_s23  ;;  %s585_s26 = sld [smem:[#allocation2 + $0x282]] }
  0x48   : > { %570 = vst.msk [vmem:[%s1001_s10 + $0x2] ss:$8 sm:$0x3] %vm993_vm0, %v305_v53  ;;  %v335_v59 = vmul.f32 %v975_v1, %v334_v57  ;;  %v338_v60 = vstv %s579_s24  ;;  %s586_s4 = sld [smem:[#allocation2 + $0x283]] }
  0x49   : > { %v323_v61 = vadd.f32 %v322_v52, %v319_v55  ;;  %v339_v62 = vmul.f32 %v979_v3, %v338_v60  ;;  %v342_v63 = vstv %s580_s25  ;;  %s1030_s6 = sld [smem:[#allocation6 + $0x5]] }
  0x4a   : > { %v336_v2 = vadd.f32 %v335_v59, %v332_v56  ;;  %v343_v4 = vmul.f32 %v982_v6, %v342_v63  ;;  %s589_s8 = sld [smem:[#allocation2 + $0x300]]  ;;  %v346_v11 = vstv %s1020_s27 }
  0x4b   : > { %v326_v5 = vadd.f32 %v325_v58, %v323_v61  ;;  %v352_v7 = vstv %s583_s28  ;;  %s590_s9 = sld [smem:[#allocation2 + $0x301]]  ;;  %s607_s28 = sshll.u32 %s833_s15, 4 }
  0x4c   : > { %v340_v8 = vadd.f32 %v339_v62, %v336_v2  ;;  %v353_v9 = vmul.f32 %v352_v7, %v973_v0  ;;  %v355_v10 = vstv %s584_s29  ;;  %s591_s20 = sld [smem:[#allocation2 + $0x302]]  ;;  %s428_s15 = scalar_lea.hbm %s1107_s3, %s607_s28 }
  0x4d   : > { %576 = vst.msk [vmem:[%s1001_s10 + $0x3] ss:$8 sm:$0x3] %vm993_vm0, %v326_v5  ;;  %v356_v12 = vmul.f32 %v975_v1, %v355_v10  ;;  %v359_v13 = vstv %s585_s26  ;;  %s592_s11 = sld [smem:[#allocation2 + $0x303]] }
  0x4e   : > { %v344_v14 = vadd.f32 %v343_v4, %v340_v8  ;;  %v360_v15 = vmul.f32 %v979_v3, %v359_v13  ;;  %v363_v16 = vstv %s586_s4  ;;  %s1040_s19 = sld [smem:[#allocation6 + $0x6]]  ;;  %s430_s4 = sshll.u32 %s1001_s10, 4  ;;  %s431_s4 = int_to_ptr.vmem [resolvable:$true] %s430_s4 }
  0x4f   : > { %v357_v17 = vadd.f32 %v356_v12, %v353_v9  ;;  %v364_v18 = vmul.f32 %v982_v6, %v363_v16  ;;  %s595_s21 = sld [smem:[#allocation2 + $0x380]]  ;;  %v367_v25 = vstv %s1030_s6  ;;  %s432_s6 = sshll.u32 %s428_s15, 4  ;;  %s433_s6 = int_to_ptr.hbm [resolvable:$true] %s432_s6 }
  0x50   : > { %v347_v19 = vadd.f32 %v346_v11, %v344_v14  ;;  %v373_v20 = vstv %s589_s8  ;;  %s596_s23 = sld [smem:[#allocation2 + $0x381]]  ;;  %s415_s8 = scalar_lea.sflag [#allocation4], %s965_s30 }
  0x51   : > { %v361_v21 = vadd.f32 %v360_v15, %v357_v17  ;;  %v374_v23 = vmul.f32 %v373_v20, %v973_v0  ;;  %v376_v24 = vstv %s590_s9  ;;  %s597_s24 = sld [smem:[#allocation2 + $0x382]]  ;;  %s765_s9 = sshra.s32 %s433_s6, 4  ;;  %s766_s9 = int_to_ptr.hbm [resolvable:$true] %s765_s9 }
  0x52   : > { %582 = vst.msk [vmem:[%s1001_s10 + $0x4] ss:$8 sm:$0x3] %vm993_vm0, %v347_v19  ;;  %v377_v26 = vmul.f32 %v975_v1, %v376_v24  ;;  %v380_v27 = vstv %s591_s20  ;;  %s598_s25 = sld [smem:[#allocation2 + $0x383]]  ;;  %s767_s20 = scalar_lea.hbm %s766_s9, 16 }
  0x53   : > { %v365_v28 = vadd.f32 %v364_v18, %v361_v21  ;;  %v381_v29 = vmul.f32 %v979_v3, %v380_v27  ;;  %v384_v30 = vstv %s592_s11  ;;  %s599_s27 = sld [smem:[#allocation6 + $0x7]]  ;;  %p768_p1 = scmp.ne.s32.totalorder %s766_s9, %s767_s20 }
  0x54   : > { %v378_v31 = vadd.f32 %v377_v26, %v374_v23  ;;  %v385_v32 = vmul.f32 %v982_v6, %v384_v30  ;;  %v388_v38 = vstv %s1040_s19  ;;  %p772_p11 = scmp.lt.s32.totalorder %s766_s9, %s1107_s3 }
  0x55   : > { %v368_v33 = vadd.f32 %v367_v25, %v365_v28  ;;  %v394_v34 = vstv %s595_s21  ;;  %p769_p3 = pnand %p768_p1, %p937_p2  ;;  %s771_s21 = scalar_lea.hbm %s1107_s3, 32 }
  0x56   : > { %v382_v35 = vadd.f32 %v381_v29, %v378_v31  ;;  %v395_v36 = vmul.f32 %v394_v34, %v973_v0  ;;  %v397_v37 = vstv %s596_s23  ;;  %p773_p12 = scmp.lt.s32.totalorder %s771_s21, %s767_s20 }
  0x57   : > { %588 = vst.msk [vmem:[%s1001_s10 + $0x5] ss:$8 sm:$0x3] %vm993_vm0, %v368_v33  ;;  %v398_v39 = vmul.f32 %v975_v1, %v397_v37  ;;  %v401_v40 = vstv %s597_s24  ;;  %p770_p7 = pneg %p769_p3 }
  0x58   : > { %v386_v41 = vadd.f32 %v385_v32, %v382_v35  ;;  %v402_v42 = vmul.f32 %v979_v3, %v401_v40  ;;  %v405_v43 = vstv %s598_s25  ;;  %p774_p13 = por %p773_p12, %p772_p11 }
  0x59   : > { %v399_v44 = vadd.f32 %v398_v39, %v395_v36  ;;  %v406_v45 = vmul.f32 %v982_v6, %v405_v43  ;;  %v409_v1 = vstv %s599_s27 }
  0x5a   : > { %v389_v0 = vadd.f32 %v388_v38, %v386_v41  ;;  %p775_p0 = pnand %p774_p13, %p770_p7 }
  0x5b   : > { %v403_v46 = vadd.f32 %v402_v42, %v399_v44 }
  0x5c   : > { %594 = vst.msk [vmem:[%s1001_s10 + $0x6] ss:$8 sm:$0x3] %vm993_vm0, %v389_v0 }
  0x5d   : > { %v407_v47 = vadd.f32 %v406_v45, %v403_v46 }
  0x5f   : > { %v410_v3 = vadd.f32 %v409_v1, %v407_v47 }
  0x61   : > { %600 = vst.msk [vmem:[%s1001_s10 + $0x7] ss:$8 sm:$0x3] %vm993_vm0, %v410_v3 }
  0x62   : > { %778 = shalt.err (!%p775_p0)
}
  0x63   : > { %618 = dma.vmem_to_hbm [thread:$0]  (%p937_p2), %s431_s4, 256, %s433_s6, %s415_s8  }
  0x64 PF: > { %s444_s30 = sand.u32 1, %s821_s12   ;;  %p632_p4 = pnand %p544_p8, %p910_p5 }
  0x65   : > { %s445_s10 = scalar_lea.sflag [#allocation4], %s444_s30 }
  0x66   : > { %p633_p6 = pneg %p632_p4 }
  0x68   : > { %816 = dma.done.wait (%p633_p6), %s445_s10, 256  }
  0x69   : > { %818 = vsyncadd (%p633_p6), %s445_s10, 4294967040  ;;  %s21_s17 = sadd.s32 1, %s841_s17   ;;  %s1115_s12 = smov %s825_s13 }
  0x6a   : > { %p18_p9 = scmp.ge.s32.totalorder %s21_s17, 4   ;;  %s1116_s13 = smov %s829_s14 }
  0x6b   : > { %s1117_s14 = smov %s947_s18  ;;  %s1118_s15 = smov %s837_s16 }
  0x6c   : > { %s1119_s16 = smov %s1121_s5  ;;  %20 = sbr.rel (!%p18_p9) target bundleno = 8 (0x8), region = 96 }
  0x71   :  { %451 = vsyncpa [#allocation3], 1 }
  0x72   :  { %453 = vsyncpa [#allocation3 + $0x1], 1 }
  0x73   :  { %454 = vsyncpa [#allocation4], 1 }
  0x74   :  { %456 = vsyncpa [#allocation4 + $0x1], 1 }
  0x75   :  { %457 = vsyncpa [#allocation5], 1 }
  0x76   :  { %459 = vsyncpa [#allocation5 + $0x1], 1 }
  0x77   :  { %460 = vsyncpa [#allocation7], 1 }

</bundles_post_ra>
